<compile_context>
chip_gen: v7x
topology: tpu7x:2x2x1
jax: 0.10.0
libtpu: 0.0.40
codegen_flags: <defaults>
</compile_context>

<pallas_src>
import math
import numpy as np
import jax
import jax.numpy as jnp
from jax.experimental import pallas as pl
from jax.experimental.pallas import tpu as pltpu

NUM_QUBIT = 4
DIM = 2 ** NUM_QUBIT  # 16 amplitudes per patch


# ---------------------------------------------------------------------------
# Classical construction of the quantum circuit (host-side parameter setup)
# ---------------------------------------------------------------------------
def _build_circuit_matrices(weight_0, weight_1):
    """16x16 unitary applied after AmplitudeEmbedding and the mean-PauliZ
    readout vector (wire 0 = most significant bit, PennyLane convention)."""
    I2 = np.eye(2, dtype=np.complex128)
    H = np.array([[1.0, 1.0], [1.0, -1.0]], dtype=np.complex128) / np.sqrt(2.0)

    def ry(t):
        c, s = np.cos(t / 2.0), np.sin(t / 2.0)
        return np.array([[c, -s], [s, c]], dtype=np.complex128)

    def rz(t):
        return np.array([[np.exp(-1j * t / 2.0), 0.0],
                         [0.0, np.exp(1j * t / 2.0)]], dtype=np.complex128)

    def single(gate, wire):
        out = np.array([[1.0]], dtype=np.complex128)
        for w in range(NUM_QUBIT):
            out = np.kron(out, gate if w == wire else I2)
        return out

    def cnot(ctrl, tgt):
        U = np.zeros((DIM, DIM), dtype=np.complex128)
        for k in range(DIM):
            bits = [(k >> (NUM_QUBIT - 1 - i)) & 1 for i in range(NUM_QUBIT)]
            if bits[ctrl] == 1:
                bits[tgt] ^= 1
            k2 = sum(b << (NUM_QUBIT - 1 - i) for i, b in enumerate(bits))
            U[k2, k] = 1.0
        return U

    U = np.eye(DIM, dtype=np.complex128)
    for w in range(NUM_QUBIT):                       # Hadamards on all wires
        U = single(H, w) @ U
    U = single(ry(weight_0[0]), 0) @ U
    U = single(ry(weight_0[1]), 1) @ U
    U = single(ry(weight_0[0]), 2) @ U
    U = single(ry(weight_0[1]), 3) @ U
    U = single(rz(weight_1[0]), 0) @ U
    U = single(rz(weight_1[1]), 1) @ U
    U = single(rz(weight_1[0]), 2) @ U
    U = single(rz(weight_1[1]), 3) @ U
    U = cnot(0, 1) @ U
    U = cnot(1, 2) @ U
    U = cnot(2, 3) @ U
    U = cnot(3, 0) @ U

    # mean over wires of <Z_i> contribution of basis state k
    m = np.zeros((DIM,), dtype=np.float64)
    for k in range(DIM):
        zs = [1.0 - 2.0 * ((k >> (NUM_QUBIT - 1 - i)) & 1) for i in range(NUM_QUBIT)]
        m[k] = float(np.mean(zs))
    return U, m


def _build_fused_observable(weight_0, weight_1):
    """A = Re(U)^T diag(m) Re(U) + Im(U)^T diag(m) Im(U)  (real symmetric 16x16).
    For a real patch vector r:  r^T A r == sum_k m_k |(U r)_k|^2 exactly."""
    U, m = _build_circuit_matrices(weight_0, weight_1)
    Ure, Uim = U.real, U.imag
    A = Ure.T @ (m[:, None] * Ure) + Uim.T @ (m[:, None] * Uim)
    return np.asarray(A, np.float64)


# ---------------------------------------------------------------------------
# Pallas kernel: fused quadratic form on a (16, tile_n) column block
# ---------------------------------------------------------------------------
def _qlayer_kernel(r_ref, a_ref, o_ref):
    # r_ref: (DIM, tile_n) f32 patch features for one batch element / tile
    # a_ref: (DIM, DIM) bf16 fused observable, already scaled by 0.5
    # o_ref: (1, tile_n) f32 output row
    r = r_ref[...]                                                    # (16, tn) f32
    # bf16 operands -> single-pass MXU matmul; f32 accumulation.
    q = jnp.dot(a_ref[...], r.astype(jnp.bfloat16),
                preferred_element_type=jnp.float32)                   # 0.5 * A @ r
    num = jnp.sum(q * r, axis=0, keepdims=True)                       # 0.5 * r^T A r
    den = jnp.sum(r * r, axis=0, keepdims=True)                       # ||r||^2
    # all-zero patches -> 0/0 -> NaN, matching AmplitudeEmbedding(normalize=True).
    # (Exact divide; switch to pl.reciprocal(den, approx=True) only if a bundle
    #  dump shows the VALU slot saturated.)
    o_ref[...] = num / den + 0.5


def quantum_nn_layer(x, weight_0, weight_1, f=2, max_tile_n=32768):
    """x: NCHW float array, returns (bs, 1, out_h, out_w) float32."""
    bs, c, H, W = x.shape
    assert c * f * f == DIM, "ch_in * f^2 must equal 2**NUM_QUBIT (=16)"

    # F.pad(input, (1, 2, 1, 2, 0, 0, 0, 0)): W pad (1,2), H pad (1,2)
    xp = jnp.pad(x, ((0, 0), (0, 0), (1, 2), (1, 2)))
    Hp, Wp = H + 3, W + 3
    oh = math.floor((Hp - f) / 1) + 1
    ow = math.floor((Wp - f) / 1) + 1
    ohw = oh * ow

    # Patch matrix kept in the natural (bs, 16, oh*ow) layout:
    # feature index = channel*f*f + (i*f + j), column = h*ow + w  (torch
    # unfold + permute ordering, per batch element). The stack is one HBM write
    # of the 4x-expanded matrix; the reshape merges adjacent axes and is free
    # (no transpose, no pad -> no extra HBM passes).
    cols = [xp[:, :, i:i + oh, j:j + ow] for i in range(f) for j in range(f)]
    regions = jnp.stack(cols, axis=2).reshape(bs, DIM, ohw).astype(jnp.float32)
    # TODO(synk): fuse the 2x2 unfold into the kernel itself (read xp directly via
    # halo'd row-band blocks / manual DMA) to remove the remaining 4x expansion.

    # Tile sizing: big lane-dense blocks (up to 2 MiB f32 input per step) to sit on
    # the HBM-roofline plateau and amortize per-grid-step overhead.
    tile_n = min(max_tile_n, pl.cdiv(ohw, 128) * 128)
    # v7x has 2 TensorCores: if there is only one batch element, make sure the
    # single data-parallel axis still has >= 2 balanced tiles.
    if bs == 1 and ohw > 256:
        tile_n = min(tile_n, pl.cdiv(pl.cdiv(ohw, 2), 128) * 128)
    n_tiles = pl.cdiv(ohw, tile_n)

    # Fused observable with the (x+1)/2 affine folded in (factor 0.5), as bf16
    # MXU operand.
    A = _build_fused_observable(np.asarray(weight_0, np.float64),
                                np.asarray(weight_1, np.float64))
    A_half = jnp.asarray(0.5 * A, jnp.bfloat16)                      # (16, 16)

    out = pl.pallas_call(
        _qlayer_kernel,
        out_shape=jax.ShapeDtypeStruct((bs, 1, ohw), jnp.float32),
        grid_spec=pltpu.PrefetchScalarGridSpec(
            num_scalar_prefetch=0,
            grid=(bs, n_tiles),
            in_specs=[
                pl.BlockSpec((None, DIM, tile_n), lambda b, i: (b, 0, i)),
                pl.BlockSpec((DIM, DIM), lambda b, i: (0, 0)),
            ],
            out_specs=pl.BlockSpec((None, 1, tile_n), lambda b, i: (b, 0, i)),
        ),
        compiler_params=pltpu.CompilerParams(
            dimension_semantics=("parallel", "parallel"),
            vmem_limit_bytes=32 * 1024 * 1024),
    )(regions, A_half)

    return out.reshape(bs, 1, oh, ow)


# ---------------------------------------------------------------------------
# Pure-numpy reference (original unfused math) for verification
# ---------------------------------------------------------------------------
def _reference_forward(x, weight_0, weight_1, f=2):
    x = np.asarray(x, np.float64)
    xp = np.pad(x, ((0, 0), (0, 0), (1, 2), (1, 2)))
    bs, c, Hp, Wp = xp.shape
    oh, ow = Hp - f + 1, Wp - f + 1
    cols = [xp[:, :, i:i + oh, j:j + ow] for i in range(f) for j in range(f)]
    patches = np.stack(cols, -1).reshape(bs, c, oh * ow, f * f)
    regions = patches.transpose(0, 2, 1, 3).reshape(-1, c * f * f)
    U, m = _build_circuit_matrices(np.asarray(weight_0, np.float64),
                                   np.asarray(weight_1, np.float64))
    with np.errstate(divide="ignore", invalid="ignore"):
        norm = np.linalg.norm(regions, axis=1, keepdims=True)
        psi = regions / norm
        state = psi @ U.T
        p = np.abs(state) ** 2
        out = (p @ m + 1.0) / 2.0
    return out.reshape(bs, 1, oh, ow).astype(np.float32)


if __name__ == "__main__":
    key = jax.random.PRNGKey(0)
    # small shapes consistent with the module: ch_in=4, f=2 -> 16 amplitudes / patch
    x = jax.random.normal(key, (2, 4, 16, 16), dtype=jnp.float32)
    # module zero-initializes the quantum weights
    weight_0 = np.zeros((2,), np.float32)
    weight_1 = np.zeros((2,), np.float32)

    out = quantum_nn_layer(x, weight_0, weight_1, f=2)
    out = jax.block_until_ready(out)
    assert out.shape == (2, 1, 18, 18), out.shape

    ref = _reference_forward(np.asarray(x), weight_0, weight_1, f=2)
    # NaNs appear (identically in both) for patches fully inside the zero padding,
    # matching AmplitudeEmbedding(normalize=True) on a zero vector. Tolerance is
    # loosened to cover the bf16 MXU operands (values are bounded in [0, 1]).
    np.testing.assert_allclose(np.asarray(out), ref, rtol=2e-2, atol=2e-2)

    print("KERNEL_OK")
</pallas_src>

<mosaic_0001>
module attributes {stable_mosaic.version = 11 : i64} {
  func.func @_qlayer_kernel(%arg0: i32, %arg1: i32, %arg2: memref<1x16x384xf32, #tpu.memory_space<vmem>>, %arg3: memref<16x16xbf16, #tpu.memory_space<vmem>>, %arg4: memref<1x1x384xf32, #tpu.memory_space<vmem>>) attributes {dimension_semantics = [#tpu.dimension_semantics<parallel>, #tpu.dimension_semantics<parallel>], iteration_bounds = array<i64: 2, 1>, scalar_prefetch = 0 : i64, scratch_operands = 0 : i64, tpu.core_type = #tpu.core_type<tc>, window_params = [{transform_indices = @transform_0, window_bounds = array<i64: 1, 16, 384>}, {pipeline_mode = #tpu.pipeline_mode<synchronous>, transform_indices = @transform_1, window_bounds = array<i64: 16, 16>}, {transform_indices = @transform_2, window_bounds = array<i64: 1, 1, 384>}]} {
    %c0 = arith.constant 0 : index
    %c0_0 = arith.constant 0 : index
    %c0_1 = arith.constant 0 : index
    %0 = vector.load %arg2[%c0, %c0_0, %c0_1] : memref<1x16x384xf32, #tpu.memory_space<vmem>>, vector<1x16x384xf32>
    %1 = vector.shape_cast %0 : vector<1x16x384xf32> to vector<16x384xf32>
    %c0_2 = arith.constant 0 : index
    %c0_3 = arith.constant 0 : index
    %2 = vector.load %arg3[%c0_2, %c0_3] : memref<16x16xbf16, #tpu.memory_space<vmem>>, vector<16x16xbf16>
    %3 = arith.truncf %1 : vector<16x384xf32> to vector<16x384xbf16>
    %cst = arith.constant dense<0.000000e+00> : vector<16x384xf32>
    %4 = tpu.matmul %2, %3, %cst {dimension_numbers = #tpu.dot_dimension_numbers<[1], [0], [0], [1], [0, 0, 1, 1], [], []>} : vector<16x16xbf16>, vector<16x384xbf16>, vector<16x384xf32> -> vector<16x384xf32>
    %5 = arith.mulf %4, %1 : vector<16x384xf32>
    %cst_4 = arith.constant dense<0.000000e+00> : vector<384xf32>
    %6 = vector.multi_reduction <add>, %5, %cst_4 [0] : vector<16x384xf32> to vector<384xf32>
    %7 = vector.shape_cast %6 : vector<384xf32> to vector<1x384xf32>
    %8 = arith.mulf %1, %1 : vector<16x384xf32>
    %cst_5 = arith.constant dense<0.000000e+00> : vector<384xf32>
    %9 = vector.multi_reduction <add>, %8, %cst_5 [0] : vector<16x384xf32> to vector<384xf32>
    %10 = vector.shape_cast %9 : vector<384xf32> to vector<1x384xf32>
    %11 = arith.divf %7, %10 : vector<1x384xf32>
    %cst_6 = arith.constant 5.000000e-01 : f32
    %12 = vector.broadcast %cst_6 : f32 to vector<1x384xf32>
    %13 = arith.addf %11, %12 : vector<1x384xf32>
    %c0_7 = arith.constant 0 : index
    %c0_8 = arith.constant 0 : index
    %c0_9 = arith.constant 0 : index
    %14 = vector.load %arg4[%c0_7, %c0_8, %c0_9] : memref<1x1x384xf32, #tpu.memory_space<vmem>>, vector<1x1x384xf32>
    %15 = vector.shape_cast %14 : vector<1x1x384xf32> to vector<1x384xf32>
    %16 = vector.shape_cast %13 : vector<1x384xf32> to vector<1x1x384xf32>
    tpu.vector_store %arg4[%c0_7, %c0_8, %c0_9], %16 {strides = array<i32>} : memref<1x1x384xf32, #tpu.memory_space<vmem>>, vector<1x1x384xf32>,
    return
  }
  func.func @transform_0(%arg0: i32, %arg1: i32) -> (i32, i32, i32) {
    %c0_i32 = arith.constant 0 : i32
    %c0_i32_0 = arith.constant 0 : i32
    return %arg0, %c0_i32, %arg1 : i32, i32, i32
  }
  func.func @transform_1(%arg0: i32, %arg1: i32) -> (i32, i32) {
    %c0_i32 = arith.constant 0 : i32
    %c0_i32_0 = arith.constant 0 : i32
    %c0_i32_1 = arith.constant 0 : i32
    return %c0_i32, %c0_i32_0 : i32, i32
  }
  func.func @transform_2(%arg0: i32, %arg1: i32) -> (i32, i32, i32) {
    %c0_i32 = arith.constant 0 : i32
    %c0_i32_0 = arith.constant 0 : i32
    return %arg0, %c0_i32, %arg1 : i32, i32, i32
  }
}

</mosaic_0001>

<bundles_post_ra>
// kernel: tpu_custom_call.1
= control target key start
LH: loop header
LB: loop body
LE: loop exit
PB: predicated region body
PF: predicated region fallthrough
CT: control target
= control target key end

     0   :  { %7 = vsyncpa [#allocation3], 0  ;;  %s1007_s0 = inlined_call_operand.hbm [shape: f32[2,16,324], index: 0, kind: input, shape index: {}]   ;;  %s1008_s1 = inlined_call_operand.hbm [shape: bf16[16,16], index: 1, kind: input, shape index: {}]   ;;  %s1009_s2 = inlined_call_operand.hbm [shape: f32[2,1,324], index: 2, kind: output, shape index: {}]  }
   0x1   :  { %9 = vsyncpa [#allocation3 + $0x1], 0 }
   0x2   :  { %10 = vsyncpa [#allocation6], 0 }
   0x3   :  { %11 = vsyncpa [#allocation4], 0 }
   0x4   :  { %13 = vsyncpa [#allocation4 + $0x1], 0  ;;  %s795_s9 = smov 0   ;;  %s797_s10 = smov 0  }
   0x5   :  { %s799_s11 = smov 0   ;;  %s801_s12 = smov 0  }
   0x6   :  { %s803_s13 = smov 0   ;;  %s805_s14 = smov 0  }
   0x7 LB: > { %s508_s15 = sadd.s32 4294967295, %s767_s14   ;;  %s509_s16 = sadd.s32 4294967294, %s767_s14   ;;  %s767_s14 = sphi %s805_s14, %s19_s14   ;;  %s763_s13 = sphi %s803_s13, %s1032_s13   ;;  %s759_s12 = sphi %s801_s12, %s1031_s12   ;;  %s755_s11 = sphi %s799_s11, %s1030_s11   ;;  %s751_s10 = sphi %s797_s10, %s1029_s10   ;;  %s747_s9 = sphi %s795_s9, %s1028_s9  }
   0x8   : > { %p53_p0 = scmp.ne.s32.totalorder %s751_s10, %s747_s9  ;;  %p829_p1 = scmp.eq.s32.totalorder %s508_s15, 0 }
   0x9   : > { %p833_p2 = scmp.eq.s32.totalorder %s508_s15, 1  ;;  %p106_p3 = scmp.eq.s32.totalorder %s509_s16, 1 }
   0xa   : > { %s1014_s17 = scalar_select %p829_p1, 1, 0 }
   0xb   : > { %s1015_s18 = scalar_select %p833_p2, 1, 0 }
   0xc   : > { %p839_p4 = por %p829_p1, %p53_p0  ;;  %p510_p5 = scmp.ge.s32.totalorder %s767_s14, 1 }
   0xd   : > { %p844_p6 = por %p106_p3, %p53_p0  ;;  %p113_p7 = scmp.lt.s32.totalorder %s767_s14, 3 }
   0xe   : > { %s1016_s19 = scalar_select %p839_p4, 1, 0 }
   0xf   : > { %s1017_s20 = scalar_select %p844_p6, 1, 0 }
  0x10   : > { %p849_p8 = pnand %p510_p5, %p113_p7  ;;  %s769_s22 = smov [#allocation5]  }
  0x11   : > { %s125_s23 = sshll.u32 %s769_s22, 4  ;;  %s31_s25 = sadd.s32 1, %s763_s13  ;;  %s126_s23 = int_to_ptr.vmem [resolvable:$true] %s125_s23 }
  0x12   : > { %s1018_s21 = scalar_select %p849_p8, 1, 0 }
  0x13   : > { %p543_p9 = pneg %p849_p8  ;;  %s623_s28 = scalar_lea.hbm %s1008_s1, 128 }
  0x14   : > { %p624_p12 = scmp.ne.s32.totalorder %s1008_s1, %s623_s28  ;;  %p630_p5 = scmp.lt.u32.totalorder %s623_s28, %s1008_s1 }
  0x15   : > { %p858_p11 = pnand %p543_p9, %p829_p1 }
  0x17   : > { %p625_p13 = pneg %p858_p11 }
  0x19   : > { %p626_p0 = pnand %p625_p13, %p624_p12 }
  0x1b   : > { %p627_p3 = pneg %p626_p0 }
  0x1d   : > { %p632_p7 = pnand %p630_p5, %p627_p3 }
  0x1f   : > { %635 = shalt.err (!%p632_p7)
}
  0x20   : > { %s636_s5 = scalar_lea.vmem %s126_s23, 128  ;;  %p644_p1 = scmp.lt.s32.totalorder %s126_s23, %s126_s23 }
  0x21   : > { %p637_p9 = scmp.ne.s32.totalorder %s126_s23, %s636_s5  ;;  %p645_p4 = scmp.lt.s32.totalorder %s636_s5, %s636_s5 }
  0x23   : > { %p639_p10 = pnand %p637_p9, %p625_p13  ;;  %p646_p8 = por %p645_p4, %p644_p1 }
  0x25   : > { %p640_p6 = pneg %p639_p10 }
  0x27   : > { %p647_p2 = pnand %p646_p8, %p640_p6 }
  0x29   : > { %650 = shalt.err (!%p647_p2)
}
  0x2a   : > { %s770_s6 = smov 64   ;;  %s771_s7 = smov 4  }
  0x2b   : > { %546 = dma.hbm_to_vmem [thread:$0]  (!%p858_p11), %s1008_s1, 128, %s126_s23, [#allocation6], %s770_s6, %s770_s6, %s771_s7  }
  0x2c   : > { %p33_p1 = scmp.ge.s32.totalorder %s31_s25, 2  ;;  %s40_s16 = sadd.s32 1, %s755_s11 }
  0x2d   : > { %p47_p2 = scmp.ne.s32.totalorder %s755_s11, %s751_s10  ;;  %p48_p4 = scmp.eq.s32.totalorder %s767_s14, 0 }
  0x2e   : > { %s1034_s25 = smov (%p33_p1, %s31_s25), 0  ;;  %p1020_p8 = scmp.ne.s32.totalorder %s1015_s18, 0 }
  0x2f   : > { %p49_p6 = por %p48_p4, %p47_p2  ;;  %s35_s26 = ssub.s32 %s763_s13, %s1034_s25 }
  0x30   : > { %p887_p10 = por %p1020_p8, %p47_p2  ;;  %p556_p12 = scmp.lt.s32.totalorder %s767_s14, 2 }
  0x31   : > { %p38_p13 = scmp.eq.s32.totalorder %s35_s26, 0  ;;  %s139_s24 = sand.u32 1, %s755_s11  }
  0x32   : > { %s530_s27 = smul.u32 48, %s139_s24  ;;  %p899_p11 = pnand %p556_p12, %p49_p6 }
  0x33   : > { %s896_s28 = scalar_select %p38_p13, %s755_s11, %s40_s16  }
  0x34   : > { %s531_s23 = smul.u32 768, %s763_s13  ;;  %s143_s29 = scalar_lea.vmem [#allocation2], %s530_s27 }
  0x35   : > { %s152_s30 = sshll.u32 %s143_s29, 4  ;;  %s910_s6 = scalar_lea.sflag [#allocation3], %s139_s24  ;;  %s908_s30 = int_to_ptr.vmem [resolvable:$true] %s152_s30 }
  0x36   : > { %s906_s5 = scalar_lea.hbm %s1007_s0, %s531_s23  ;;  %p653_p3 = pneg %p899_p11 }
  0x37   : > { %s651_s7 = scalar_lea.hbm %s906_s5, 768  ;;  %s656_s16 = scalar_lea.hbm %s1007_s0, 1536 }
  0x38   : > { %p652_p0 = scmp.ne.s32.totalorder %s906_s5, %s651_s7  ;;  %p657_p9 = scmp.lt.u32.totalorder %s906_s5, %s1007_s0 }
  0x39   : > { %p658_p1 = scmp.lt.u32.totalorder %s656_s16, %s651_s7  ;;  %p660_p4 = scmp.lt.u32.totalorder %s651_s7, %s906_s5 }
  0x3a   : > { %p654_p5 = pnand %p653_p3, %p652_p0 }
  0x3b   : > { %p659_p2 = por %p658_p1, %p657_p9 }
  0x3c   : > { %p655_p7 = pneg %p654_p5 }
  0x3d   : > { %p661_p6 = por %p660_p4, %p659_p2 }
  0x3f   : > { %p662_p8 = pnand %p661_p6, %p655_p7 }
  0x41   : > { %665 = shalt.err (!%p662_p8)
}
  0x42   : > { %s666_s24 = scalar_lea.vmem %s908_s30, 768  ;;  %s772_s23 = smov [#allocation2]  }
  0x43   : > { %p667_p12 = scmp.ne.s32.totalorder %s908_s30, %s666_s24  ;;  %s671_s29 = sshll.u32 %s772_s23, 4  ;;  %s672_s29 = int_to_ptr.vmem [resolvable:$false] %s671_s29 }
  0x44   : > { %s673_s4 = scalar_lea.vmem %s672_s29, 1536  ;;  %p674_p5 = scmp.lt.s32.totalorder %s908_s30, %s672_s29 }
  0x45   : > { %p669_p13 = pnand %p667_p12, %p653_p3  ;;  %p675_p9 = scmp.lt.s32.totalorder %s673_s4, %s666_s24 }
  0x47   : > { %p670_p0 = pneg %p669_p13  ;;  %p676_p1 = por %p675_p9, %p674_p5 }
  0x49   : > { %p677_p2 = pnand %p676_p1, %p670_p0 }
  0x4b   : > { %680 = shalt.err (!%p677_p2)
}
  0x4c   : > { %s773_s18 = smov 384   ;;  %s774_s7 = smov 24  }
  0x4d   : > { %550 = dma.hbm_to_vmem [thread:$0]  (!%p899_p11), %s906_s5, 768, %s908_s30, %s910_s6, %s773_s18, %s773_s18, %s774_s7  }
  0x4e   : > { %p1023_p3 = scmp.ne.s32.totalorder %s1018_s21, 0 }
  0x4f   : > { %s941_s8 = sand.u32 (!%p1023_p3), 1, %s751_s10   ;;  %p1024_p7 = scmp.ne.s32.totalorder (!%p1023_p3), %s1016_s19, 0 }
  0x50   : > { %164 = sbr.rel (%p1023_p3) target bundleno = 356 (0x164), region = 28  ;;  %s167_s16 = scalar_lea.sflag (!%p1023_p3), [#allocation3], %s941_s8 }
  0x51   : > { %s532_s15 = smul.u32 (!%p1023_p3), 48, %s941_s8 }
  0x53   : > { %s170_s26 = scalar_lea.vmem (!%p1023_p3), [#allocation2], %s532_s15 }
  0x57   : > { %734 = dma.done.wait (%p1024_p7), %s167_s16, 768  }
  0x58   : > { %736 = vsyncadd (%p1024_p7), %s167_s16, 4294966528  ;;  %p1025_p4 = scmp.ne.s32.totalorder %s1014_s17, 0 }
  0x5a   : > { %738 = dma.done.wait (%p1025_p4), [#allocation6], 128  }
  0x5b   : > { %740 = vsyncadd (%p1025_p4), [#allocation6], 4294967168  ;;  %v775_v0 = vmov 0.0   ;;  %vm776_vm0 = vmmov 0   ;;  %v777_v1 = vmov 0   ;;  %v199_v2 = vld [vmem:[%s170_s26 + $0x8] sm:$0xff] }
  0x5c   : > { %524 = vmatprep.subr.bf16.mxu1 %v775_v0  ;;  %526 = vmatprep.mubr.msk.bf16.mxu1 %vm776_vm0, %v775_v0  ;;  %v202_v3 = vld [vmem:[%s170_s26 + $0x20] sm:$0xff]  ;;  %v200_v4 = vld [vmem:[%s170_s26 + $0x10] sm:$0xff]  ;;  %v203_v6 = vld [vmem:[%s170_s26 + $0x28] sm:$0xff]  ;;  %vm214_vm1 = vcmask 130048   ;;  %v330_v16 = vmul.f32 %v199_v2, %v199_v2  ;;  %s533_s17 = smul.u32 3, %s941_s8  ;;  %s398_s27 = scalar_lea.sflag [#allocation4], %s941_s8 }
  0x5d   : > { %250 = vmatprep.mubr.bf16.mxu0 %v777_v1  ;;  %v207_v5 = vpack.c.bf16 %v202_v3, %v199_v2  ;;  %v198_v7 = vld [vmem:[%s170_s26] sm:$0xff]  ;;  %v201_v8 = vld [vmem:[%s170_s26 + $0x18] sm:$0xff]  ;;  %v208_v9 = vpack.c.bf16 %v203_v6, %v200_v4  ;;  %v331_v12 = vmul.f32 %v200_v4, %v200_v4  ;;  %v334_v13 = vmul.f32 %v203_v6, %v203_v6  ;;  %s534_s19 = smul.u32 48, %s759_s12  ;;  %s779_s12 = smov [#allocation7]  }
  0x5e   : > { %v206_v10 = vpack.c.bf16 %v201_v8, %v198_v7  ;;  %v616_v11 = vld [vmem:[#allocation5] sm:$0xff]   ;;  %v329_v14 = vmul.f32 %v198_v7, %v198_v7  ;;  %v332_v15 = vmul.f32 %v201_v8, %v201_v8  ;;  %v333_v17 = vmul.f32 %v202_v3, %v202_v3  ;;  %s194_s21 = scalar_lea.vmem [#allocation7], %s533_s17  ;;  %s685_s23 = sshll.u32 %s779_s12, 4  ;;  %s686_s23 = int_to_ptr.vmem [resolvable:$false] %s685_s23 }
  0x5f   : > { %218 = vmatprep.subr.bf16.mxu0 %v207_v5  ;;  %525 = vmatpush3.bf16.msra.mxu1 %v208_v9  ;;  %v349_v18 = vadd.f32 %v334_v13, %v331_v12  ;;  %s414_s30 = sshll.u32 %s194_s21, 4  ;;  %s958_s6 = scalar_lea.hbm %s1009_s2, %s534_s19  ;;  %s960_s30 = int_to_ptr.vmem [resolvable:$true] %s414_s30 }
  0x60   : > { %219 = vmatpush1.bf16.msra.mxu0 %v206_v10  ;;  %v335_v19 = vadd.f32 %v332_v15, %v329_v14  ;;  %v342_v20 = vadd.f32 %v333_v17, %v330_v16  ;;  %s681_s24 = scalar_lea.vmem %s960_s30, 48  ;;  %s687_s29 = scalar_lea.vmem %s686_s23, 96 }
  0x61   : > { %v350_v21 = vrot.slane %v349_v18, 4  ;;  %p682_p11 = scmp.ne.s32.totalorder %s960_s30, %s681_s24  ;;  %p688_p12 = scmp.lt.s32.totalorder %s960_s30, %s686_s23 }
  0x62   : > { %527 = vmatmul.mubr.msk.bf16.vlgmr.msra.gmra.mrb[0].mxu1 %vm214_vm1, %v616_v11  ;;  %v336_v22 = vrot.slane %v335_v19, 4  ;;  %v343_v23 = vrot.slane %v342_v20, 4  ;;  %p689_p13 = scmp.lt.s32.totalorder %s687_s29, %s681_s24 }
  0x63   : > { %517 = vmatmul.mubr.msk.bf16.vlgmr.msra.gmra.mrb[0].mxu0 %vm214_vm1, %v616_v11  ;;  %v351_v24 = vadd.f32 %v350_v21, %v349_v18  ;;  %p683_p6 = pnand %p682_p11, %p887_p10 }
  0x64   : > { %v337_v25 = vadd.f32 %v336_v22, %v335_v19  ;;  %v344_v26 = vadd.f32 %v343_v23, %v342_v20  ;;  %p690_p0 = por %p689_p13, %p688_p12 }
  0x65   : > { %v352_v27 = vrot.slane %v351_v24, 2  ;;  %p684_p8 = pneg %p683_p6 }
  0x66   : > { %v338_v28 = vrot.slane %v337_v25, 2  ;;  %v345_v29 = vrot.slane %v344_v26, 2 }
  0x67   : > { %v353_v30 = vadd.f32 %v352_v27, %v351_v24  ;;  %p691_p5 = pnand %p690_p0, %p684_p8 }
  0x68   : > { %v339_v31 = vadd.f32 %v338_v28, %v337_v25  ;;  %v346_v32 = vadd.f32 %v345_v29, %v344_v26 }
  0x69   : > { %v354_v33 = vrot.slane %v353_v30, 1 }
  0x6a   : > { %v340_v34 = vrot.slane %v339_v31, 1  ;;  %v347_v35 = vrot.slane %v346_v32, 1 }
  0x6b   : > { %v355_v38 = vadd.f32 %v354_v33, %v353_v30 }
  0x6c   : > { %v341_v42 = vadd.f32 %v340_v34, %v339_v31  ;;  %v348_v45 = vadd.f32 %v347_v35, %v346_v32 }
  0x6d   : > { %617 = vrcp.f32 %v355_v38 }
  0x6e   : > { %619 = vrcp.f32 %v341_v42 }
  0x6f   : > { %621 = vrcp.f32 %v348_v45 }
 0x135   : > { %v295_v36 = vpop.f32.mrb[0].mxu1 }
 0x136   : > { %v252_v37 = vpop.f32.mrb[0].mxu0  ;;  %v304_v39 = vmul.f32 %v295_v36, %v200_v4  ;;  %v528_v40 = vpop.f32.mrb[1].mxu1 }
 0x137   : > { %v254_v41 = vpop.f32.mrb[1].mxu0  ;;  %v298_v43 = vpop.f32.mrb[2].mxu1  ;;  %v302_v46 = vmul.f32 %v252_v37, %v198_v7 }
 0x138   : > { %v256_v44 = vpop.f32.mrb[2].mxu0  ;;  %v307_v47 = vmul.f32 %v298_v43, %v203_v6  ;;  %v529_v50 = vpop.f32.mrb[3].mxu1  ;;  %v303_v51 = vmul.f32 %v254_v41, %v199_v2  ;;  %v778_v2 = vmov 1966171168   ;;  %v372_v6 = vlaneseq }
 0x139   : > { %v305_v48 = vmul.f32 %v256_v44, %v201_v8  ;;  %v258_v49 = vpop.f32.mrb[3].mxu0  ;;  %v618_v7 = vpop.eup %617 }
 0x13a   : > { %v306_v52 = vmul.f32 %v258_v49, %v202_v3  ;;  %v322_v53 = vadd.f32 %v307_v47, %v304_v39  ;;  %v370_v3 = vunpack.c.l.s4 %v778_v2  ;;  %v620_v10 = vpop.eup %619  ;;  %v373_v17 = vshrl.u32 %v372_v6, 7 }
 0x13b   : > { %v308_v54 = vadd.f32 %v305_v48, %v302_v46  ;;  %v622_v12 = vpop.eup %621  ;;  %vm394_vm2 = vcmp.lt.s32.totalorder %v372_v6, 384 }
 0x13c   : > { %v315_v55 = vadd.f32 %v306_v52, %v303_v51  ;;  %v323_v56 = vrot.slane %v322_v53, 4  ;;  %v371_v16 = vunpack.c.0.s8 %v370_v3 }
 0x13d   : > { %v309_v57 = vrot.slane %v308_v54, 4 }
 0x13e   : > { %v316_v58 = vrot.slane %v315_v55, 4  ;;  %v324_v59 = vadd.f32 %v323_v56, %v322_v53  ;;  %v374_v24 = vsub.s32 %v371_v16, %v373_v17 }
 0x13f   : > { %v310_v60 = vadd.f32 %v309_v57, %v308_v54 }
 0x140   : > { %v317_v61 = vadd.f32 %v316_v58, %v315_v55  ;;  %v325_v62 = vrot.slane %v324_v59, 2 }
 0x141   : > { %v311_v63 = vrot.slane %v310_v60, 2 }
 0x142   : > { %v318_v0 = vrot.slane %v317_v61, 2  ;;  %v326_v1 = vadd.f32 %v325_v62, %v324_v59 }
 0x143   : > { %v312_v4 = vadd.f32 %v311_v63, %v310_v60 }
 0x144   : > { %v319_v5 = vadd.f32 %v318_v0, %v317_v61  ;;  %v327_v8 = vrot.slane %v326_v1, 1 }
 0x145   : > { %v313_v9 = vrot.slane %v312_v4, 1 }
 0x146   : > { %v320_v11 = vrot.slane %v319_v5, 1  ;;  %v328_v13 = vadd.f32 %v327_v8, %v326_v1 }
 0x147   : > { %v314_v14 = vadd.f32 %v313_v9, %v312_v4 }
 0x148   : > { %v321_v15 = vadd.f32 %v320_v11, %v319_v5  ;;  %v361_v18 = vmul.f32 %v618_v7, %v328_v13 }
 0x149   : > { %v357_v19 = vmul.f32 %v620_v10, %v314_v14 }
 0x14a   : > { %v359_v20 = vmul.f32 %v622_v12, %v321_v15  ;;  %v364_v22 = vadd.f32 0.5, %v361_v18 }
 0x14b   : > { %v362_v21 = vadd.f32 0.5, %v357_v19 }
 0x14c   : > { %v363_v23 = vadd.f32 0.5, %v359_v20  ;;  %v382_v27 = vrot.slane %v364_v22, %v374_v24 }
 0x14e   : > { %v368_v25 = vcombine.low %v362_v21, %v363_v23 }
 0x150   : > { %v375_v26 = vrot.slane %v368_v25, %v374_v24 }
 0x152   : > { %v383_v28 = vcombine.low %v375_v26, %v382_v27 }
 0x154   : > { %v390_v29 = vrot.slane %v383_v28, %v374_v24 }
 0x156   : > { %396 = vst.msk [vmem:[%s194_s21] sm:$0x7] %vm394_vm2, %v390_v29 }
 0x157   : > { %694 = shalt.err (!%p691_p5)
}
 0x158   : > { %s695_s4 = scalar_lea.hbm %s958_s6, 48  ;;  %s699_s8 = scalar_lea.hbm %s1009_s2, 96 }
 0x159   : > { %p696_p9 = scmp.ne.s32.totalorder %s958_s6, %s695_s4  ;;  %p700_p3 = scmp.lt.u32.totalorder %s958_s6, %s1009_s2 }
 0x15a   : > { %p701_p7 = scmp.lt.u32.totalorder %s699_s8, %s695_s4  ;;  %p703_p11 = scmp.lt.u32.totalorder %s695_s4, %s958_s6 }
 0x15b   : > { %p697_p1 = pnand %p696_p9, %p887_p10 }
 0x15c   : > { %p702_p4 = por %p701_p7, %p700_p3 }
 0x15d   : > { %p698_p2 = pneg %p697_p1 }
 0x15e   : > { %p704_p6 = por %p703_p11, %p702_p4 }
 0x160   : > { %p705_p8 = pnand %p704_p6, %p698_p2 }
 0x162   : > { %708 = shalt.err (!%p705_p8)
}
 0x163   : > { %541 = dma.vmem_to_hbm [thread:$0]  (%p887_p10), %s960_s30, 48, %s958_s6, %s398_s27  }
 0x164 PF: > { %s426_s26 = sand.u32 1, %s747_s9   ;;  %p1026_p12 = scmp.ne.s32.totalorder %s1017_s20, 0 }
 0x165   : > { %p1027_p13 = scmp.ge.s32.totalorder %s767_s14, 2  ;;  %s427_s17 = scalar_lea.sflag [#allocation4], %s426_s26 }
 0x167   : > { %p552_p0 = pnand %p1027_p13, %p1026_p12 }
 0x169   : > { %742 = dma.done.wait (!%p552_p0), %s427_s17, 48  }
 0x16a   : > { %744 = vsyncadd (!%p552_p0), %s427_s17, 4294967248  ;;  %s19_s14 = sadd.s32 1, %s767_s14   ;;  %s1028_s9 = smov %s751_s10 }
 0x16b   : > { %p16_p5 = scmp.ge.s32.totalorder %s19_s14, 4   ;;  %s1029_s10 = smov %s755_s11 }
 0x16c   : > { %s1030_s11 = smov %s896_s28  ;;  %s1031_s12 = smov %s763_s13 }
 0x16d   : > { %s1032_s13 = smov %s1034_s25  ;;  %18 = sbr.rel (!%p16_p5) target bundleno = 7 (0x7), region = 77 }
 0x174   :  { %432 = vsyncpa [#allocation3], 1 }
 0x175   :  { %434 = vsyncpa [#allocation3 + $0x1], 1 }
 0x176   :  { %435 = vsyncpa [#allocation6], 1 }
 0x177   :  { %436 = vsyncpa [#allocation4], 1 }
 0x178   :  { %438 = vsyncpa [#allocation4 + $0x1], 1 }

</bundles_post_ra>
